<compile_context>
chip_gen: v7x
topology: tpu7x:2x2x1
jax: 0.10.0
libtpu: 0.0.40
codegen_flags: <defaults>
</compile_context>

<pallas_src>
import jax
import jax.numpy as jnp
from jax.experimental import pallas as pl
from jax.experimental.pallas import tpu as pltpu

NEG_SLOPE = 0.01  # torch.nn.LeakyReLU default


def _leaky_relu(x):
    return jnp.where(x > 0, x, NEG_SLOPE * x)


def _make_critic_kernel(epilogue_dtype):
    def critic_kernel(x_ref,
                      w1_ref, b1_ref,
                      w2_ref, b2_ref,
                      w3_ref, b3_ref,
                      w4_ref, b4_ref,
                      w5_ref, b5_ref,
                      o_ref):
        def hidden(h, w_ref, b_ref):
            # bf16 MXU operands, f32 accumulation; bias + LeakyReLU epilogue in
            # `epilogue_dtype` (bf16 on v6e/v7x, f32 on v5e whose VPU is f32-only).
            acc = jnp.dot(h, w_ref[...], preferred_element_type=jnp.float32)
            a = acc.astype(epilogue_dtype) + b_ref[...].astype(epilogue_dtype)
            return _leaky_relu(a).astype(jnp.bfloat16)

        h = x_ref[...].astype(jnp.bfloat16)
        h = hidden(h, w1_ref, b1_ref)
        h = hidden(h, w2_ref, b2_ref)
        h = hidden(h, w3_ref, b3_ref)
        h = hidden(h, w4_ref, b4_ref)

        # Layer 5 (H -> 1): VPU multiply + XLU cross-lane reduce (avoids a
        # 1-output-lane MXU matmul).  The (Bt,1) column is relayouted to a
        # lane-dense (1,Bt) row so the store is full-width and contiguous.
        col = jnp.sum(h.astype(jnp.float32) * w5_ref[...], axis=-1, keepdims=True)
        col = col + b5_ref[...]
        o_ref[...] = col.reshape(1, -1).astype(o_ref.dtype)

    return critic_kernel


def _round_up(x, m):
    return ((x + m - 1) // m) * m


def _pick_batch_tile(B, in_size, *, max_tile=2048):
    """Batch-tile heuristic:
      * large tiles (grid steps are almost pure overhead at H=128), capped so
        the f32 x tile stays a few MiB (well inside 32 MiB scoped VMEM on
        v5e/v6e/v7x, including v7x's 64 MiB physical VMEM),
      * when more than one step is needed, keep the step count EVEN so the
        "parallel" grid axis splits cleanly across v7x's two TensorCores.
    """
    row_cap = max(256, (((4 << 20) // max(4 * in_size, 1)) // 256) * 256)
    max_tile = min(max_tile, row_cap)
    if B <= min(1024, max_tile):
        return max(8, _round_up(B, 8))            # single tile, grid == 1
    steps = _round_up(pl.cdiv(B, max_tile), 2)     # even number of grid steps
    return min(max_tile, _round_up(pl.cdiv(B, steps), 256))


def _default_epilogue_dtype():
    try:
        kind = jax.devices()[0].device_kind.lower()
    except Exception:
        return jnp.float32
    # v6e / v7x VPUs handle bf16 natively; v5e (and older) keep the f32 epilogue.
    return jnp.bfloat16 if ("v6" in kind or "v7" in kind) else jnp.float32


def critic_forward(x, params, *, batch_tile=None, epilogue_dtype=None):
    """x: (B, input_size). params: dict of (w_i, b_i). Returns (B, 1) float32."""
    B, in_size = x.shape
    H = params["w1"].shape[1]
    if batch_tile is None:
        batch_tile = _pick_batch_tile(B, in_size)
    if epilogue_dtype is None:
        epilogue_dtype = _default_epilogue_dtype()

    # Tiny batches only: pad up to the next sublane multiple (<= 7 rows) so the
    # single block never exceeds the array.  Large ragged batches are NOT
    # padded (no extra HBM copy of x): the last grid step reads a partially
    # out-of-bounds block whose unspecified rows only produce output rows that
    # are sliced off below — no cross-row reduction anywhere in the kernel.
    if batch_tile > B:
        x = jnp.pad(x, ((0, batch_tile - B), (0, 0)))
    grid_n = pl.cdiv(x.shape[0], batch_tile)
    Bp = grid_n * batch_tile

    # Weights/biases (~0.26 MiB total) use constant (0,0) index maps: fetched
    # once and never re-fetched between consecutive grid steps.
    # TODO(synk): single-buffer these constant blocks via
    # pipeline_mode=pl.Buffered(1) once confirmed on the target jax version.
    full = lambda shape: pl.BlockSpec(shape, lambda i: (0, 0))

    in_specs = [
        pl.BlockSpec((batch_tile, in_size), lambda i: (i, 0)),   # x tile
        full((in_size, H)), full((1, H)),                        # layer 1
        full((H, H)),       full((1, H)),                        # layer 2
        full((H, H)),       full((1, H)),                        # layer 3
        full((H, H)),       full((1, H)),                        # layer 4
        full((1, H)),       full((1, 1)),                        # layer 5 (row vec)
    ]
    # Lane-dense output: one contiguous (1, Bp) row; each grid step writes a
    # full-width (1, batch_tile) slab (unmasked vst, contiguous writeback DMA).
    out_spec = pl.BlockSpec((1, batch_tile), lambda i: (0, i))

    weight_bytes = sum(int(p.nbytes) for p in params.values())
    flops = 2 * B * (in_size * H + 3 * H * H + H)
    # Constant-index weight blocks are fetched once, not once per grid step.
    bytes_accessed = int(x.nbytes) + Bp * 4 + weight_bytes

    out_row = pl.pallas_call(
        _make_critic_kernel(epilogue_dtype),
        out_shape=jax.ShapeDtypeStruct((1, Bp), jnp.float32),
        grid_spec=pltpu.PrefetchScalarGridSpec(
            num_scalar_prefetch=0,
            grid=(grid_n,),
            in_specs=in_specs,
            out_specs=out_spec,
        ),
        compiler_params=pltpu.CompilerParams(
            dimension_semantics=("parallel",),
            vmem_limit_bytes=32 * 1024 * 1024,  # safe on v5e/v6e/v7x
        ),
        cost_estimate=pl.CostEstimate(
            flops=flops, transcendentals=0, bytes_accessed=bytes_accessed),
    )(x,
      params["w1"], params["b1"],
      params["w2"], params["b2"],
      params["w3"], params["b3"],
      params["w4"], params["b4"],
      params["w5"], params["b5"])

    return out_row.reshape(-1)[:B, None]


def init_critic_params(key, input_size, hidden_size=128):
    """Synthetic init matching nn.Linear's shapes and default uniform range.

    Weights stored transposed as (in, out). w1..w4 are bf16 (MXU operands);
    w5 is an f32 (1, H) row vector for the VPU reduction; biases are f32
    (1, out) for lane-friendly broadcast.
    """
    dims = [(input_size, hidden_size),
            (hidden_size, hidden_size),
            (hidden_size, hidden_size),
            (hidden_size, hidden_size),
            (hidden_size, 1)]
    params = {}
    for idx, (din, dout) in enumerate(dims, start=1):
        key, kw, kb = jax.random.split(key, 3)
        bound = 1.0 / (din ** 0.5)  # PyTorch default uniform init range
        w = jax.random.uniform(kw, (din, dout), jnp.float32,
                               minval=-bound, maxval=bound)
        b = jax.random.uniform(kb, (1, dout), jnp.float32,
                               minval=-bound, maxval=bound)
        if idx < 5:
            params[f"w{idx}"] = w.astype(jnp.bfloat16)
        else:
            params[f"w{idx}"] = w.T  # (1, H) f32 row vector for layer 5
        params[f"b{idx}"] = b
    return params


def critic_ref(x, params):
    """Pure-JAX reference (weights upcast to f32)."""
    h = x
    for i in range(1, 5):
        h = h @ params[f"w{i}"].astype(jnp.float32) + params[f"b{i}"]
        h = jnp.where(h > 0, h, NEG_SLOPE * h)
    return h @ params["w5"].astype(jnp.float32).T + params["b5"]


if __name__ == "__main__":
    key = jax.random.PRNGKey(0)
    k_param, k_x = jax.random.split(key)

    BATCH = 8
    INPUT_SIZE = 32
    HIDDEN = 128

    params = init_critic_params(k_param, INPUT_SIZE, HIDDEN)

    def check(B):
        xb = jax.random.normal(jax.random.fold_in(k_x, B),
                               (B, INPUT_SIZE), jnp.float32)
        out = jax.block_until_ready(critic_forward(xb, params))
        ref = critic_ref(xb, params)
        assert out.shape == (B, 1), out.shape
        # bf16 MXU operands / activations -> tolerance loosened vs. pure f32.
        assert jnp.allclose(out, ref, atol=5e-2, rtol=5e-2), (
            f"B={B}: max abs err {jnp.max(jnp.abs(out - ref))}")

    check(BATCH)   # single small tile, grid == 1
    check(300)     # grid == 1, sublane-alignment (<=7 row) padding path
    check(1100)    # grid == 2 (even split for v7x TCs), ragged last tile via OOB blocks

    print("KERNEL_OK")
</pallas_src>

<mosaic_0001>
module attributes {stable_mosaic.version = 11 : i64} {
  func.func @critic_kernel(%arg0: i32, %arg1: memref<8x32xf32, #tpu.memory_space<vmem>>, %arg2: memref<32x128xbf16, #tpu.memory_space<vmem>>, %arg3: memref<1x128xf32, #tpu.memory_space<vmem>>, %arg4: memref<128x128xbf16, #tpu.memory_space<vmem>>, %arg5: memref<1x128xf32, #tpu.memory_space<vmem>>, %arg6: memref<128x128xbf16, #tpu.memory_space<vmem>>, %arg7: memref<1x128xf32, #tpu.memory_space<vmem>>, %arg8: memref<128x128xbf16, #tpu.memory_space<vmem>>, %arg9: memref<1x128xf32, #tpu.memory_space<vmem>>, %arg10: memref<1x128xf32, #tpu.memory_space<vmem>>, %arg11: memref<1x1xf32, #tpu.memory_space<vmem>>, %arg12: memref<1x8xf32, #tpu.memory_space<vmem>>) attributes {dimension_semantics = [#tpu.dimension_semantics<parallel>], iteration_bounds = array<i64: 1>, scalar_prefetch = 0 : i64, scratch_operands = 0 : i64, tpu.core_type = #tpu.core_type<tc>, window_params = [{transform_indices = @transform_0, window_bounds = array<i64: 8, 32>}, {pipeline_mode = #tpu.pipeline_mode<synchronous>, transform_indices = @transform_1, window_bounds = array<i64: 32, 128>}, {pipeline_mode = #tpu.pipeline_mode<synchronous>, transform_indices = @transform_2, window_bounds = array<i64: 1, 128>}, {pipeline_mode = #tpu.pipeline_mode<synchronous>, transform_indices = @transform_3, window_bounds = array<i64: 128, 128>}, {pipeline_mode = #tpu.pipeline_mode<synchronous>, transform_indices = @transform_4, window_bounds = array<i64: 1, 128>}, {pipeline_mode = #tpu.pipeline_mode<synchronous>, transform_indices = @transform_5, window_bounds = array<i64: 128, 128>}, {pipeline_mode = #tpu.pipeline_mode<synchronous>, transform_indices = @transform_6, window_bounds = array<i64: 1, 128>}, {pipeline_mode = #tpu.pipeline_mode<synchronous>, transform_indices = @transform_7, window_bounds = array<i64: 128, 128>}, {pipeline_mode = #tpu.pipeline_mode<synchronous>, transform_indices = @transform_8, window_bounds = array<i64: 1, 128>}, {pipeline_mode = #tpu.pipeline_mode<synchronous>, transform_indices = @transform_9, window_bounds = array<i64: 1, 128>}, {pipeline_mode = #tpu.pipeline_mode<synchronous>, transform_indices = @transform_10, window_bounds = array<i64: 1, 1>}, {transform_indices = @transform_11, window_bounds = array<i64: 1, 8>}]} {
    %c0 = arith.constant 0 : index
    %c0_0 = arith.constant 0 : index
    %0 = vector.load %arg1[%c0, %c0_0] : memref<8x32xf32, #tpu.memory_space<vmem>>, vector<8x32xf32>
    %1 = arith.truncf %0 : vector<8x32xf32> to vector<8x32xbf16>
    %c0_1 = arith.constant 0 : index
    %c0_2 = arith.constant 0 : index
    %2 = vector.load %arg2[%c0_1, %c0_2] : memref<32x128xbf16, #tpu.memory_space<vmem>>, vector<32x128xbf16>
    %cst = arith.constant dense<0.000000e+00> : vector<8x128xf32>
    %3 = tpu.matmul %1, %2, %cst {dimension_numbers = #tpu.dot_dimension_numbers<[1], [0], [0], [1], [0, 0, 1, 1], [], []>} : vector<8x32xbf16>, vector<32x128xbf16>, vector<8x128xf32> -> vector<8x128xf32>
    %c0_3 = arith.constant 0 : index
    %c0_4 = arith.constant 0 : index
    %4 = vector.load %arg3[%c0_3, %c0_4] : memref<1x128xf32, #tpu.memory_space<vmem>>, vector<1x128xf32>
    %5 = vector.broadcast %4 : vector<1x128xf32> to vector<8x128xf32>
    %6 = arith.addf %3, %5 : vector<8x128xf32>
    %cst_5 = arith.constant 0.000000e+00 : f32
    %7 = vector.broadcast %cst_5 : f32 to vector<8x128xf32>
    %8 = arith.cmpf ogt, %6, %7 : vector<8x128xf32>
    %cst_6 = arith.constant 0.00999999977 : f32
    %9 = vector.broadcast %cst_6 : f32 to vector<8x128xf32>
    %10 = arith.mulf %9, %6 : vector<8x128xf32>
    %11 = arith.select %8, %6, %10 : vector<8x128xi1>, vector<8x128xf32>
    %12 = arith.truncf %11 : vector<8x128xf32> to vector<8x128xbf16>
    %c0_7 = arith.constant 0 : index
    %c0_8 = arith.constant 0 : index
    %13 = vector.load %arg4[%c0_7, %c0_8] : memref<128x128xbf16, #tpu.memory_space<vmem>>, vector<128x128xbf16>
    %cst_9 = arith.constant dense<0.000000e+00> : vector<8x128xf32>
    %14 = tpu.matmul %12, %13, %cst_9 {dimension_numbers = #tpu.dot_dimension_numbers<[1], [0], [0], [1], [0, 0, 1, 1], [], []>} : vector<8x128xbf16>, vector<128x128xbf16>, vector<8x128xf32> -> vector<8x128xf32>
    %c0_10 = arith.constant 0 : index
    %c0_11 = arith.constant 0 : index
    %15 = vector.load %arg5[%c0_10, %c0_11] : memref<1x128xf32, #tpu.memory_space<vmem>>, vector<1x128xf32>
    %16 = vector.broadcast %15 : vector<1x128xf32> to vector<8x128xf32>
    %17 = arith.addf %14, %16 : vector<8x128xf32>
    %cst_12 = arith.constant 0.000000e+00 : f32
    %18 = vector.broadcast %cst_12 : f32 to vector<8x128xf32>
    %19 = arith.cmpf ogt, %17, %18 : vector<8x128xf32>
    %cst_13 = arith.constant 0.00999999977 : f32
    %20 = vector.broadcast %cst_13 : f32 to vector<8x128xf32>
    %21 = arith.mulf %20, %17 : vector<8x128xf32>
    %22 = arith.select %19, %17, %21 : vector<8x128xi1>, vector<8x128xf32>
    %23 = arith.truncf %22 : vector<8x128xf32> to vector<8x128xbf16>
    %c0_14 = arith.constant 0 : index
    %c0_15 = arith.constant 0 : index
    %24 = vector.load %arg6[%c0_14, %c0_15] : memref<128x128xbf16, #tpu.memory_space<vmem>>, vector<128x128xbf16>
    %cst_16 = arith.constant dense<0.000000e+00> : vector<8x128xf32>
    %25 = tpu.matmul %23, %24, %cst_16 {dimension_numbers = #tpu.dot_dimension_numbers<[1], [0], [0], [1], [0, 0, 1, 1], [], []>} : vector<8x128xbf16>, vector<128x128xbf16>, vector<8x128xf32> -> vector<8x128xf32>
    %c0_17 = arith.constant 0 : index
    %c0_18 = arith.constant 0 : index
    %26 = vector.load %arg7[%c0_17, %c0_18] : memref<1x128xf32, #tpu.memory_space<vmem>>, vector<1x128xf32>
    %27 = vector.broadcast %26 : vector<1x128xf32> to vector<8x128xf32>
    %28 = arith.addf %25, %27 : vector<8x128xf32>
    %cst_19 = arith.constant 0.000000e+00 : f32
    %29 = vector.broadcast %cst_19 : f32 to vector<8x128xf32>
    %30 = arith.cmpf ogt, %28, %29 : vector<8x128xf32>
    %cst_20 = arith.constant 0.00999999977 : f32
    %31 = vector.broadcast %cst_20 : f32 to vector<8x128xf32>
    %32 = arith.mulf %31, %28 : vector<8x128xf32>
    %33 = arith.select %30, %28, %32 : vector<8x128xi1>, vector<8x128xf32>
    %34 = arith.truncf %33 : vector<8x128xf32> to vector<8x128xbf16>
    %c0_21 = arith.constant 0 : index
    %c0_22 = arith.constant 0 : index
    %35 = vector.load %arg8[%c0_21, %c0_22] : memref<128x128xbf16, #tpu.memory_space<vmem>>, vector<128x128xbf16>
    %cst_23 = arith.constant dense<0.000000e+00> : vector<8x128xf32>
    %36 = tpu.matmul %34, %35, %cst_23 {dimension_numbers = #tpu.dot_dimension_numbers<[1], [0], [0], [1], [0, 0, 1, 1], [], []>} : vector<8x128xbf16>, vector<128x128xbf16>, vector<8x128xf32> -> vector<8x128xf32>
    %c0_24 = arith.constant 0 : index
    %c0_25 = arith.constant 0 : index
    %37 = vector.load %arg9[%c0_24, %c0_25] : memref<1x128xf32, #tpu.memory_space<vmem>>, vector<1x128xf32>
    %38 = vector.broadcast %37 : vector<1x128xf32> to vector<8x128xf32>
    %39 = arith.addf %36, %38 : vector<8x128xf32>
    %cst_26 = arith.constant 0.000000e+00 : f32
    %40 = vector.broadcast %cst_26 : f32 to vector<8x128xf32>
    %41 = arith.cmpf ogt, %39, %40 : vector<8x128xf32>
    %cst_27 = arith.constant 0.00999999977 : f32
    %42 = vector.broadcast %cst_27 : f32 to vector<8x128xf32>
    %43 = arith.mulf %42, %39 : vector<8x128xf32>
    %44 = arith.select %41, %39, %43 : vector<8x128xi1>, vector<8x128xf32>
    %45 = arith.truncf %44 : vector<8x128xf32> to vector<8x128xbf16>
    %46 = arith.extf %45 : vector<8x128xbf16> to vector<8x128xf32>
    %c0_28 = arith.constant 0 : index
    %c0_29 = arith.constant 0 : index
    %47 = vector.load %arg10[%c0_28, %c0_29] : memref<1x128xf32, #tpu.memory_space<vmem>>, vector<1x128xf32>
    %48 = vector.broadcast %47 : vector<1x128xf32> to vector<8x128xf32>
    %49 = arith.mulf %46, %48 : vector<8x128xf32>
    %cst_30 = arith.constant dense<0.000000e+00> : vector<8xf32>
    %50 = vector.multi_reduction <add>, %49, %cst_30 [1] : vector<8x128xf32> to vector<8xf32>
    %51 = vector.shape_cast %50 : vector<8xf32> to vector<8x1xf32>
    %c0_31 = arith.constant 0 : index
    %c0_32 = arith.constant 0 : index
    %52 = vector.load %arg11[%c0_31, %c0_32] : memref<1x1xf32, #tpu.memory_space<vmem>>, vector<1x1xf32>
    %53 = vector.broadcast %52 : vector<1x1xf32> to vector<8x1xf32>
    %54 = arith.addf %51, %53 : vector<8x1xf32>
    %55 = vector.shape_cast %54 : vector<8x1xf32> to vector<1x8xf32>
    %c0_33 = arith.constant 0 : index
    %c0_34 = arith.constant 0 : index
    %56 = vector.load %arg12[%c0_33, %c0_34] : memref<1x8xf32, #tpu.memory_space<vmem>>, vector<1x8xf32>
    tpu.vector_store %arg12[%c0_33, %c0_34], %55 {strides = array<i32>} : memref<1x8xf32, #tpu.memory_space<vmem>>, vector<1x8xf32>,
    return
  }
  func.func @transform_0(%arg0: i32) -> (i32, i32) {
    %c0_i32 = arith.constant 0 : i32
    %c0_i32_0 = arith.constant 0 : i32
    return %arg0, %c0_i32 : i32, i32
  }
  func.func @transform_1(%arg0: i32) -> (i32, i32) {
    %c0_i32 = arith.constant 0 : i32
    %c0_i32_0 = arith.constant 0 : i32
    %c0_i32_1 = arith.constant 0 : i32
    return %c0_i32, %c0_i32_0 : i32, i32
  }
  func.func @transform_2(%arg0: i32) -> (i32, i32) {
    %c0_i32 = arith.constant 0 : i32
    %c0_i32_0 = arith.constant 0 : i32
    %c0_i32_1 = arith.constant 0 : i32
    return %c0_i32, %c0_i32_0 : i32, i32
  }
  func.func @transform_3(%arg0: i32) -> (i32, i32) {
    %c0_i32 = arith.constant 0 : i32
    %c0_i32_0 = arith.constant 0 : i32
    %c0_i32_1 = arith.constant 0 : i32
    return %c0_i32, %c0_i32_0 : i32, i32
  }
  func.func @transform_4(%arg0: i32) -> (i32, i32) {
    %c0_i32 = arith.constant 0 : i32
    %c0_i32_0 = arith.constant 0 : i32
    %c0_i32_1 = arith.constant 0 : i32
    return %c0_i32, %c0_i32_0 : i32, i32
  }
  func.func @transform_5(%arg0: i32) -> (i32, i32) {
    %c0_i32 = arith.constant 0 : i32
    %c0_i32_0 = arith.constant 0 : i32
    %c0_i32_1 = arith.constant 0 : i32
    return %c0_i32, %c0_i32_0 : i32, i32
  }
  func.func @transform_6(%arg0: i32) -> (i32, i32) {
    %c0_i32 = arith.constant 0 : i32
    %c0_i32_0 = arith.constant 0 : i32
    %c0_i32_1 = arith.constant 0 : i32
    return %c0_i32, %c0_i32_0 : i32, i32
  }
  func.func @transform_7(%arg0: i32) -> (i32, i32) {
    %c0_i32 = arith.constant 0 : i32
    %c0_i32_0 = arith.constant 0 : i32
    %c0_i32_1 = arith.constant 0 : i32
    return %c0_i32, %c0_i32_0 : i32, i32
  }
  func.func @transform_8(%arg0: i32) -> (i32, i32) {
    %c0_i32 = arith.constant 0 : i32
    %c0_i32_0 = arith.constant 0 : i32
    %c0_i32_1 = arith.constant 0 : i32
    return %c0_i32, %c0_i32_0 : i32, i32
  }
  func.func @transform_9(%arg0: i32) -> (i32, i32) {
    %c0_i32 = arith.constant 0 : i32
    %c0_i32_0 = arith.constant 0 : i32
    %c0_i32_1 = arith.constant 0 : i32
    return %c0_i32, %c0_i32_0 : i32, i32
  }
  func.func @transform_10(%arg0: i32) -> (i32, i32) {
    %c0_i32 = arith.constant 0 : i32
    %c0_i32_0 = arith.constant 0 : i32
    %c0_i32_1 = arith.constant 0 : i32
    return %c0_i32, %c0_i32_0 : i32, i32
  }
  func.func @transform_11(%arg0: i32) -> (i32, i32) {
    %c0_i32 = arith.constant 0 : i32
    %c0_i32_0 = arith.constant 0 : i32
    return %c0_i32, %arg0 : i32, i32
  }
}

</mosaic_0001>

<bundles_post_ra>
// kernel: tpu_custom_call.1
= control target key start
LH: loop header
LB: loop body
LE: loop exit
PB: predicated region body
PF: predicated region fallthrough
CT: control target
= control target key end

     0   :  { %s1091_s0 = inlined_call_operand.hbm [shape: f32[8,32], index: 0, kind: input, shape index: {}]   ;;  %s1092_s1 = inlined_call_operand.hbm [shape: bf16[32,128], index: 1, kind: input, shape index: {}]   ;;  %s1093_s2 = inlined_call_operand.vmem [shape: f32[1,128], index: 2, kind: input, shape index: {}]   ;;  %s1094_s3 = inlined_call_operand.hbm [shape: bf16[128,128], index: 3, kind: input, shape index: {}]   ;;  %s1095_s4 = inlined_call_operand.vmem [shape: f32[1,128], index: 4, kind: input, shape index: {}]   ;;  %s1096_s5 = inlined_call_operand.hbm [shape: bf16[128,128], index: 5, kind: input, shape index: {}]   ;;  %s1097_s6 = inlined_call_operand.vmem [shape: f32[1,128], index: 6, kind: input, shape index: {}]   ;;  %s1098_s7 = inlined_call_operand.hbm [shape: bf16[128,128], index: 7, kind: input, shape index: {}]   ;;  %s1099_s8 = inlined_call_operand.vmem [shape: f32[1,128], index: 8, kind: input, shape index: {}]   ;;  %s1100_s9 = inlined_call_operand.vmem [shape: f32[1,128], index: 9, kind: input, shape index: {}]   ;;  %s1101_s10 = inlined_call_operand.<no memory space> [shape: f32[1,1], index: 10, kind: input, shape index: {}]   ;;  %s1102_s11 = inlined_call_operand.hbm [shape: f32[1,8], index: 11, kind: output, shape index: {}]  }
   0x1   :  { %v16_v0 = vstv %s1101_s10 }
   0x2   :  { %17 = vst [vmem:[#allocation2] sm:$0x1] %v16_v0 }
   0x3   :  { %18 = vsyncpa [#allocation4], 0 }
   0x4   :  { %19 = vsyncpa [#allocation7], 0 }
   0x5   :  { %20 = vsyncpa [#allocation10], 0 }
   0x6   :  { %21 = vsyncpa [#allocation5], 0  ;;  %s884_s19 = smov [#allocation6]   ;;  %s744_s23 = scalar_lea.hbm %s1092_s1, 256 }
   0x7   :  { %s37_s20 = sshll.u32 %s884_s19, 4  ;;  %p745_p0 = scmp.ne.s32.totalorder %s1092_s1, %s744_s23  ;;  %s38_s20 = int_to_ptr.vmem [resolvable:$true] %s37_s20 }
   0x8   :  { %p748_p1 = scmp.lt.u32.totalorder %s744_s23, %s1092_s1 }
   0xa   :  { %p750_p2 = pnand %p748_p1, %p745_p0 }
   0xc   :  { %753 = shalt.err (!%p750_p2)
}
   0xd   :  { %s754_s10 = scalar_lea.vmem %s38_s20, 256  ;;  %p759_p4 = scmp.lt.s32.totalorder %s38_s20, %s38_s20 }
   0xe   :  { %p755_p3 = scmp.ne.s32.totalorder %s38_s20, %s754_s10  ;;  %p760_p5 = scmp.lt.s32.totalorder %s754_s10, %s754_s10 }
  0x10   :  { %p761_p6 = por %p760_p5, %p759_p4 }
  0x12   :  { %p762_p7 = pnand %p761_p6, %p755_p3 }
  0x14   :  { %765 = shalt.err (!%p762_p7)
}
  0x15   :  { %s885_s28 = smov 64   ;;  %s886_s29 = smov 4  }
  0x16   :  { %43 = dma.hbm_to_vmem [thread:$0]  %s1092_s1, 256, %s38_s20, [#allocation7], %s885_s28, %s885_s28, %s886_s29  }
  0x17   :  { %s887_s13 = smov [#allocation9]   ;;  %s888_s15 = smov [#allocation3]  }
  0x18   :  { %s65_s14 = sshll.u32 %s887_s13, 4  ;;  %s28_s16 = sshll.u32 %s888_s15, 4  ;;  %s66_s14 = int_to_ptr.vmem [resolvable:$true] %s65_s14  ;;  %s29_s16 = int_to_ptr.vmem [resolvable:$true] %s28_s16 }
  0x19   :  { %s766_s19 = scalar_lea.hbm %s1096_s5, 1024 }
  0x1a   :  { %p767_p8 = scmp.ne.s32.totalorder %s1096_s5, %s766_s19  ;;  %p770_p9 = scmp.lt.u32.totalorder %s766_s19, %s1096_s5 }
  0x1c   :  { %p772_p10 = pnand %p770_p9, %p767_p8 }
  0x1e   :  { %775 = shalt.err (!%p772_p10)
}
  0x1f   :  { %s776_s1 = scalar_lea.vmem %s66_s14, 1024  ;;  %p781_p12 = scmp.lt.s32.totalorder %s66_s14, %s66_s14 }
  0x20   :  { %p777_p11 = scmp.ne.s32.totalorder %s66_s14, %s776_s1  ;;  %p782_p13 = scmp.lt.s32.totalorder %s776_s1, %s776_s1 }
  0x22   :  { %p783_p0 = por %p782_p13, %p781_p12 }
  0x24   :  { %p784_p1 = pnand %p783_p0, %p777_p11 }
  0x26   :  { %787 = shalt.err (!%p784_p1)
}
  0x27   :  { %71 = dma.hbm_to_vmem [thread:$0]  %s1096_s5, 1024, %s66_s14, [#allocation10], %s885_s28, %s885_s28, %s886_s29  }
  0x28   :  { %s788_s10 = scalar_lea.hbm %s1091_s0, 128 }
  0x29   :  { %p789_p2 = scmp.ne.s32.totalorder %s1091_s0, %s788_s10  ;;  %p792_p3 = scmp.lt.u32.totalorder %s788_s10, %s1091_s0 }
  0x2b   :  { %p794_p4 = pnand %p792_p3, %p789_p2 }
  0x2d   :  { %797 = shalt.err (!%p794_p4)
}
  0x2e   :  { %s798_s17 = scalar_lea.vmem %s29_s16, 128  ;;  %p803_p6 = scmp.lt.s32.totalorder %s29_s16, %s29_s16 }
  0x2f   :  { %p799_p5 = scmp.ne.s32.totalorder %s29_s16, %s798_s17  ;;  %p804_p7 = scmp.lt.s32.totalorder %s798_s17, %s798_s17 }
  0x31   :  { %p805_p8 = por %p804_p7, %p803_p6 }
  0x33   :  { %p806_p9 = pnand %p805_p8, %p799_p5 }
  0x35   :  { %809 = shalt.err (!%p806_p9)
}
  0x36   :  { %31 = dma.hbm_to_vmem [thread:$0]  %s1091_s0, 128, %s29_s16, [#allocation4]  }
  0x37   :  { %s889_s18 = smov [#allocation8]   ;;  %s890_s21 = smov [#allocation11]  }
  0x38   :  { %s51_s19 = sshll.u32 %s889_s18, 4  ;;  %s79_s22 = sshll.u32 %s890_s21, 4  ;;  %s52_s19 = int_to_ptr.vmem [resolvable:$true] %s51_s19  ;;  %s80_s22 = int_to_ptr.vmem [resolvable:$true] %s79_s22 }
  0x39   :  { %s810_s1 = scalar_lea.hbm %s1094_s3, 1024 }
  0x3a   :  { %p811_p10 = scmp.ne.s32.totalorder %s1094_s3, %s810_s1  ;;  %p814_p11 = scmp.lt.u32.totalorder %s810_s1, %s1094_s3 }
  0x3c   :  { %p816_p12 = pnand %p814_p11, %p811_p10 }
  0x3e   :  { %819 = shalt.err (!%p816_p12)
}
  0x3f   :  { %s820_s0 = scalar_lea.vmem %s52_s19, 1024  ;;  %p825_p0 = scmp.lt.s32.totalorder %s52_s19, %s52_s19 }
  0x40   :  { %p821_p13 = scmp.ne.s32.totalorder %s52_s19, %s820_s0  ;;  %p826_p1 = scmp.lt.s32.totalorder %s820_s0, %s820_s0 }
  0x42   :  { %p827_p2 = por %p826_p1, %p825_p0 }
  0x44   :  { %p828_p3 = pnand %p827_p2, %p821_p13 }
  0x46   :  { %831 = shalt.err (!%p828_p3)
}
  0x47   :  { %57 = dma.hbm_to_vmem [thread:$0]  %s1094_s3, 1024, %s52_s19, [#allocation7], %s885_s28, %s885_s28, %s886_s29  }
  0x48   :  { %s832_s13 = scalar_lea.hbm %s1098_s7, 1024 }
  0x49   :  { %p833_p4 = scmp.ne.s32.totalorder %s1098_s7, %s832_s13  ;;  %p836_p5 = scmp.lt.u32.totalorder %s832_s13, %s1098_s7 }
  0x4b   :  { %p838_p6 = pnand %p836_p5, %p833_p4 }
  0x4d   :  { %841 = shalt.err (!%p838_p6)
}
  0x4e   :  { %s842_s18 = scalar_lea.vmem %s80_s22, 1024  ;;  %p847_p8 = scmp.lt.s32.totalorder %s80_s22, %s80_s22 }
  0x4f   :  { %p843_p7 = scmp.ne.s32.totalorder %s80_s22, %s842_s18  ;;  %p848_p9 = scmp.lt.s32.totalorder %s842_s18, %s842_s18 }
  0x51   :  { %p849_p10 = por %p848_p9, %p847_p8 }
  0x53   :  { %p850_p11 = pnand %p849_p10, %p843_p7 }
  0x55   :  { %853 = shalt.err (!%p850_p11)
}
  0x56   :  { %85 = dma.hbm_to_vmem [thread:$0]  %s1098_s7, 1024, %s80_s22, [#allocation10], %s885_s28, %s885_s28, %s886_s29  }
  0x57   :  { %876 = dma.done.wait [#allocation4], 128  }
  0x58   :  { %877 = vsyncadd [#allocation4], 4294967168 }
  0x59   :  { %878 = dma.done.wait [#allocation7], 1280  }
  0x5a   :  { %879 = vsyncadd [#allocation7], 4294966016 }
  0x5b   :  { %880 = dma.done.wait [#allocation10], 2048  }
  0x5c   :  { %881 = vsyncadd [#allocation10], 4294965248  ;;  %v891_v1 = vmov 0.0   ;;  %vm892_vm0 = vmmov 0   ;;  %v718_v2 = vld [vmem:[#allocation6] sm:$0xff]   ;;  %v719_v3 = vld [vmem:[#allocation6 + $0x8] sm:$0xff]  }
  0x5d   :  { %638 = vmatprep.subr.bf16.mxu0 %v891_v1  ;;  %642 = vmatprep.mubr.msk.bf16.mxu0 %vm892_vm0, %v891_v1  ;;  %v108_v4 = vld [vmem:[#allocation3] sm:$0xff]  ;;  %v720_v5 = vld [vmem:[#allocation8] sm:$0xff]   ;;  %vm133_vm1 = vcmask 261120   ;;  %v722_v8 = vld [vmem:[#allocation8 + $0x10] sm:$0xff]   ;;  %vm556_vm6 = vcmask 57344  }
  0x5e   :  { %646 = vmatprep.subr.bf16.mxu1 %v891_v1  ;;  %662 = vmatprep.mubr.msk.bf16.mxu1 %vm892_vm0, %v891_v1  ;;  %v109_v6 = vpack.c.bf16 %v108_v4, %v108_v4  ;;  %v721_v7 = vld [vmem:[#allocation8 + $0x8] sm:$0xff]   ;;  %v723_v9 = vld [vmem:[#allocation8 + $0x18] sm:$0xff]   ;;  %v724_v10 = vld [vmem:[#allocation8 + $0x20] sm:$0xff]  }
  0x5f   :  { %639 = vmatpush3.bf16.msra.mxu0 %v718_v2  ;;  %647 = vmatpush3.bf16.msra.mxu1 %v720_v5  ;;  %v725_v11 = vld [vmem:[#allocation8 + $0x28] sm:$0xff]   ;;  %v726_v12 = vld [vmem:[#allocation8 + $0x30] sm:$0xff]   ;;  %v727_v13 = vld [vmem:[#allocation8 + $0x38] sm:$0xff]   ;;  %v893_v5 = vmov 0  }
  0x60   :  { %640 = vmatprep.subr.bf16.mxu0 %v891_v1  ;;  %648 = vmatprep.subr.bf16.mxu1 %v891_v1  ;;  %v728_v14 = vld [vmem:[#allocation9] sm:$0xff]   ;;  %v729_v15 = vld [vmem:[#allocation9 + $0x8] sm:$0xff]   ;;  %v730_v16 = vld [vmem:[#allocation9 + $0x10] sm:$0xff]  }
  0x61   :  { %v731_v17 = vld [vmem:[#allocation9 + $0x18] sm:$0xff]   ;;  %v732_v18 = vld [vmem:[#allocation9 + $0x20] sm:$0xff]   ;;  %v733_v19 = vld [vmem:[#allocation9 + $0x28] sm:$0xff]   ;;  %717 = vset.pattern.permute.xlu0 %v893_v5 }
  0x62   :  { %v575_v20 = vld [vmem:[%s1093_s2] ss:$0 sm:$0xff]  ;;  %v734_v29 = vld [vmem:[#allocation9 + $0x30] sm:$0xff]   ;;  %v735_v30 = vld [vmem:[#allocation9 + $0x38] sm:$0xff]  }
  0x63   :  { %641 = vmatpush3.bf16.msra.mxu0 %v719_v3  ;;  %649 = vmatpush3.bf16.msra.mxu1 %v721_v7  ;;  %v736_v31 = vld [vmem:[#allocation11] sm:$0xff]   ;;  %v737_v32 = vld [vmem:[#allocation11 + $0x8] sm:$0xff]   ;;  %v738_v33 = vld [vmem:[#allocation11 + $0x10] sm:$0xff]  }
  0x64   :  { %666 = vmatprep.subr.bf16.mxu0 %v891_v1  ;;  %650 = vmatprep.subr.bf16.mxu1 %v891_v1  ;;  %v739_v34 = vld [vmem:[#allocation11 + $0x18] sm:$0xff]   ;;  %v740_v35 = vld [vmem:[#allocation11 + $0x20] sm:$0xff]   ;;  %v741_v36 = vld [vmem:[#allocation11 + $0x28] sm:$0xff]  }
  0x65   :  { %v579_v37 = vld [vmem:[%s1095_s4] ss:$0 sm:$0xff]  ;;  %v742_v46 = vld [vmem:[#allocation11 + $0x30] sm:$0xff]   ;;  %v743_v47 = vld [vmem:[#allocation11 + $0x38] sm:$0xff]  }
  0x66   :  { %643 = vmatmul.mubr.msk.bf16.vlgmr.msra.gmra.mrb[0].mxu0 %vm133_vm1, %v109_v6  ;;  %v588_v48 = vld [vmem:[%s1097_s6] ss:$0 sm:$0xff] }
  0x67   :  { %682 = vmatprep.mubr.msk.bf16.mxu0 %vm892_vm0, %v891_v1  ;;  %651 = vmatpush3.bf16.msra.mxu1 %v722_v8  ;;  %v597_v57 = vld [vmem:[%s1099_s8] ss:$0 sm:$0xff]  ;;  %s894_s8 = smov [#allocation12]  }
  0x68   :  { %652 = vmatprep.subr.bf16.mxu1 %v891_v1  ;;  %667 = vmatpush3.bf16.msra.mxu0 %v728_v14  ;;  %v606_v2 = vld [vmem:[%s1100_s9] ss:$0 sm:$0xff]  ;;  %s564_s1 = sshll.u32 %s894_s8, 4  ;;  %s565_s1 = int_to_ptr.vmem [resolvable:$true] %s564_s1 }
  0x69   :  { %668 = vmatprep.subr.bf16.mxu0 %v891_v1  ;;  %v607_v6 = vld [vmem:[#allocation2] ss:$0 sm:$0xff]  ;;  %s854_s9 = scalar_lea.vmem %s565_s1, 16  ;;  %s858_s20 = scalar_lea.vmem %s565_s1, 32 }
  0x6a   :  { %p855_p12 = scmp.ne.s32.totalorder %s565_s1, %s854_s9  ;;  %p859_p13 = scmp.lt.s32.totalorder %s565_s1, %s565_s1 }
  0x6b   :  { %653 = vmatpush3.bf16.msra.mxu1 %v723_v9  ;;  %v549_v9 = vlaneseq  ;;  %p860_p0 = scmp.lt.s32.totalorder %s858_s20, %s854_s9 }
  0x6c   :  { %654 = vmatprep.subr.bf16.mxu1 %v891_v1  ;;  %669 = vmatpush3.bf16.msra.mxu0 %v729_v15 }
  0x6d   :  { %670 = vmatprep.subr.bf16.mxu0 %v891_v1  ;;  %p861_p1 = por %p860_p0, %p859_p13 }
  0x6f   :  { %655 = vmatpush3.bf16.msra.mxu1 %v724_v10  ;;  %v550_v10 = vand.u32 127, %v549_v9  ;;  %p862_p2 = pnand %p861_p1, %p855_p12 }
  0x70   :  { %656 = vmatprep.subr.bf16.mxu1 %v891_v1  ;;  %671 = vmatpush3.bf16.msra.mxu0 %v730_v16 }
  0x71   :  { %672 = vmatprep.subr.bf16.mxu0 %v891_v1 }
  0x73   :  { %657 = vmatpush3.bf16.msra.mxu1 %v725_v11  ;;  %v552_v11 = vshrl.u32 %v549_v9, 7 }
  0x74   :  { %658 = vmatprep.subr.bf16.mxu1 %v891_v1  ;;  %673 = vmatpush3.bf16.msra.mxu0 %v731_v17 }
  0x75   :  { %674 = vmatprep.subr.bf16.mxu0 %v891_v1 }
  0x77   :  { %659 = vmatpush3.bf16.msra.mxu1 %v726_v12  ;;  %v553_v12 = vsub.s32 %v550_v10, %v552_v11 }
  0x78   :  { %660 = vmatprep.subr.bf16.mxu1 %v891_v1  ;;  %675 = vmatpush3.bf16.msra.mxu0 %v732_v18 }
  0x79   :  { %676 = vmatprep.subr.bf16.mxu0 %v891_v1 }
  0x7b   :  { %661 = vmatpush3.bf16.msra.mxu1 %v727_v13 }
  0x7c   :  { %686 = vmatprep.subr.bf16.mxu1 %v891_v1  ;;  %677 = vmatpush3.bf16.msra.mxu0 %v733_v19 }
  0x7d   :  { %678 = vmatprep.subr.bf16.mxu0 %v891_v1 }
  0x80   :  { %679 = vmatpush3.bf16.msra.mxu0 %v734_v29 }
  0x81   :  { %680 = vmatprep.subr.bf16.mxu0 %v891_v1 }
  0x84   :  { %681 = vmatpush3.bf16.msra.mxu0 %v735_v30 }
 0x139   :  { %v171_v21 = vpop.f32.mrb[0].mxu0 }
 0x13a   :  { %v172_v22 = vadd.f32 %v575_v20, %v171_v21  ;;  %v644_v23 = vpop.f32.mrb[1].mxu0 }
 0x13b   :  { %v174_v24 = vpop.f32.mrb[2].mxu0 }
 0x13c   :  { %vm177_vm2 = vcmp.gt.f32.partialorder %v172_v22, 0.0  ;;  %v178_v25 = vmul.f32 0.01, %v172_v22  ;;  %v645_v26 = vpop.f32.mrb[3].mxu0 }
 0x13e   :  { %v179_v27 = vsel %vm177_vm2, %v172_v22, %v178_v25 }
 0x13f   :  { %v180_v28 = vpack.c.bf16 %v179_v27, %v179_v27 }
 0x141   :  { %663 = vmatmul.mubr.bf16.vlgmr.msra.gmra.mrb[0].mxu1 %v180_v28 }
 0x142   :  { %702 = vmatprep.mubr.msk.bf16.mxu1 %vm892_vm0, %v891_v1  ;;  %687 = vmatpush3.bf16.msra.mxu1 %v736_v31 }
 0x143   :  { %688 = vmatprep.subr.bf16.mxu1 %v891_v1 }
 0x146   :  { %689 = vmatpush3.bf16.msra.mxu1 %v737_v32 }
 0x147   :  { %690 = vmatprep.subr.bf16.mxu1 %v891_v1 }
 0x14a   :  { %691 = vmatpush3.bf16.msra.mxu1 %v738_v33 }
 0x14b   :  { %692 = vmatprep.subr.bf16.mxu1 %v891_v1 }
 0x14e   :  { %693 = vmatpush3.bf16.msra.mxu1 %v739_v34 }
 0x14f   :  { %694 = vmatprep.subr.bf16.mxu1 %v891_v1 }
 0x152   :  { %695 = vmatpush3.bf16.msra.mxu1 %v740_v35 }
 0x153   :  { %696 = vmatprep.subr.bf16.mxu1 %v891_v1 }
 0x156   :  { %697 = vmatpush3.bf16.msra.mxu1 %v741_v36 }
 0x157   :  { %698 = vmatprep.subr.bf16.mxu1 %v891_v1 }
 0x15a   :  { %699 = vmatpush3.bf16.msra.mxu1 %v742_v46 }
 0x15b   :  { %700 = vmatprep.subr.bf16.mxu1 %v891_v1 }
 0x15e   :  { %701 = vmatpush3.bf16.msra.mxu1 %v743_v47 }
 0x214   :  { %v286_v38 = vpop.f32.mrb[0].mxu1 }
 0x215   :  { %v287_v39 = vadd.f32 %v579_v37, %v286_v38  ;;  %v664_v40 = vpop.f32.mrb[1].mxu1 }
 0x216   :  { %v289_v41 = vpop.f32.mrb[2].mxu1 }
 0x217   :  { %vm292_vm3 = vcmp.gt.f32.partialorder %v287_v39, 0.0  ;;  %v293_v42 = vmul.f32 0.01, %v287_v39  ;;  %v665_v43 = vpop.f32.mrb[3].mxu1 }
 0x219   :  { %v294_v44 = vsel %vm292_vm3, %v287_v39, %v293_v42 }
 0x21a   :  { %v295_v45 = vpack.c.bf16 %v294_v44, %v294_v44 }
 0x21c   :  { %683 = vmatmul.mubr.bf16.vlgmr.msra.gmra.mrb[4].mxu0 %v295_v45 }
 0x2ef   :  { %v401_v49 = vpop.f32.mrb[4].mxu0 }
 0x2f0   :  { %v402_v50 = vadd.f32 %v588_v48, %v401_v49  ;;  %v684_v51 = vpop.f32.mrb[5].mxu0 }
 0x2f1   :  { %v404_v52 = vpop.f32.mrb[6].mxu0 }
 0x2f2   :  { %vm407_vm4 = vcmp.gt.f32.partialorder %v402_v50, 0.0  ;;  %v408_v53 = vmul.f32 0.01, %v402_v50  ;;  %v685_v54 = vpop.f32.mrb[7].mxu0 }
 0x2f4   :  { %v409_v55 = vsel %vm407_vm4, %v402_v50, %v408_v53 }
 0x2f5   :  { %v410_v56 = vpack.c.bf16 %v409_v55, %v409_v55 }
 0x2f7   :  { %703 = vmatmul.mubr.bf16.vlgmr.msra.gmra.mrb[4].mxu1 %v410_v56 }
 0x3ca   :  { %v516_v58 = vpop.f32.mrb[4].mxu1 }
 0x3cb   :  { %v517_v59 = vadd.f32 %v597_v57, %v516_v58  ;;  %v704_v60 = vpop.f32.mrb[5].mxu1 }
 0x3cc   :  { %v519_v61 = vpop.f32.mrb[6].mxu1 }
 0x3cd   :  { %v523_v62 = vmul.f32 0.01, %v517_v59  ;;  %v705_v63 = vpop.f32.mrb[7].mxu1  ;;  %vm522_vm5 = vcmp.gt.f32.partialorder %v517_v59, 0.0 }
 0x3cf   :  { %v524_v0 = vsel %vm522_vm5, %v517_v59, %v523_v62 }
 0x3d0   :  { %v525_v1 = vpack.c.bf16 %v524_v0, %v524_v0 }
 0x3d2   :  { %v526_v3 = vunpack.c.l.bf16 %v525_v1 }
 0x3d4   :  { %v534_v4 = vmul.f32 %v606_v2, %v526_v3 }
 0x3d6   :  { %535 = vadd.xlane.f32.xlu0 %v534_v4 }
 0x463   :  { %v536_v7 = vpop.xlane.xlu0 %535 }
 0x464   :  { %v544_v8 = vadd.f32 %v607_v6, %v536_v7 }
 0x466   :  { %547 = vperm.xlu0 %717, %v544_v8  }
 0x4e5   :  { %v548_v13 = vpop.permute.xlu0 %547 }
 0x4e6   :  { %v554_v14 = vrot.slane %v548_v13, %v553_v12 }
 0x4e8   :  { %557 = vst.msk [vmem:[#allocation12] sm:$0x1] %vm556_vm6, %v554_v14 }
 0x4e9   :  { %865 = shalt.err (!%p862_p2)
}
 0x4ea   :  { %s866_s27 = scalar_lea.hbm %s1102_s11, 16 }
 0x4eb   :  { %p867_p3 = scmp.ne.s32.totalorder %s1102_s11, %s866_s27  ;;  %p870_p4 = scmp.lt.u32.totalorder %s866_s27, %s1102_s11 }
 0x4ed   :  { %p872_p5 = pnand %p870_p4, %p867_p3 }
 0x4ef   :  { %875 = shalt.err (!%p872_p5)
}
 0x4f0   :  { %567 = dma.vmem_to_hbm [thread:$0]  %s565_s1, 16, %s1102_s11, [#allocation5]  }
 0x4f1   :  { %882 = dma.done.wait [#allocation5], 16  }
 0x4f2   :  { %883 = vsyncadd [#allocation5], 4294967280 }
 0x4f3   :  { %571 = vsyncpa [#allocation4], 1 }
 0x4f4   :  { %572 = vsyncpa [#allocation7], 1 }
 0x4f5   :  { %573 = vsyncpa [#allocation10], 1 }
 0x4f6   :  { %574 = vsyncpa [#allocation5], 1 }

</bundles_post_ra>
